<compile_context>
chip_gen: v6e
topology: v6e:2x2x1
jax: 0.10.0
libtpu: 0.0.40
codegen_flags: <defaults>
</compile_context>

<pallas_src>
import jax
import jax.numpy as jnp
from jax import lax
from jax.experimental import pallas as pl
from jax.experimental.pallas import tpu as pltpu


def _softplus(x):
    # matches torch.nn.Softplus(beta=1, threshold=20): linear above the threshold.
    return jnp.where(x > 20.0, x, jnp.log1p(jnp.exp(jnp.minimum(x, 20.0))))


def make_som_mlp_kernel(num_linear, l_y):
    """num_linear = number of nn.Linear layers (hidden layers + final 1-unit layer)."""
    assert num_linear >= 2

    def kernel(x_ref, y_ref, *refs):
        # x_ref: (1, l_x, d) VMEM tile; y_ref: (1, c_blk*l_y, d) VMEM tile (candidates
        # pre-flattened along the token axis on the host side).
        # Param refs (in order): w1_top (d,h1), w1_bot (d,h1), b1 (1,h1),
        #   [w_i (h_{i-1},h_i), b_i (1,h_i)] for middle layers,
        #   w_last (1,h_last) f32, b_last (1,1) f32.   Last ref = output (1,1,1,c_blk).
        o_ref = refs[-1]
        p = refs[:-1]
        w1_top_ref, w1_bot_ref, b1_ref = p[0], p[1], p[2]
        mid = p[3:3 + 2 * (num_linear - 2)]
        w_last_ref, b_last_ref = p[-2], p[-1]

        x = x_ref[0]                       # (l_x, d)        compute dtype (no up-cast)
        y2 = y_ref[0]                      # (c_blk*l_y, d)  compute dtype
        l_x, d = x.shape
        c_blk = y2.shape[0] // l_y
        cdt = x.dtype
        h1 = w1_top_ref.shape[1]

        # ---- SoM similarity: ONE wide MXU call (N = c_blk*l_y, lane-dense) ----
        s2 = lax.dot_general(x, y2, (((1,), (1,)), ((), ())),
                             preferred_element_type=jnp.float32)           # (l_x, c*l_y)
        s3 = jnp.transpose(s2.reshape(l_x, c_blk, l_y), (1, 0, 2))         # (c, l_x, l_y)

        # ---- first-index argmax -> one-hot (VPU/XLU only) ----
        m = jnp.max(s3, axis=-1, keepdims=True)                            # (c, l_x, 1)
        col = lax.broadcasted_iota(jnp.int32, s3.shape, 2)
        amax = jnp.min(jnp.where(s3 >= m, col, l_y), axis=-1, keepdims=True)
        onehot = (col == amax).astype(jnp.float32)                         # (c, l_x, l_y)

        # ---- gather reordered with the first layer:  onehot @ (y @ W1_y) ----
        # The K=d work is one large matmul; the batched part has K=l_y only.  The
        # selection picks whole f32 rows (exactly one nonzero per one-hot row), so the
        # result equals gathering y first and then projecting.
        yw1 = jnp.dot(y2, w1_bot_ref[...],
                      preferred_element_type=jnp.float32)                  # (c*l_y, h1)
        y_fc = jnp.einsum('cxy,cyh->cxh', onehot, yw1.reshape(c_blk, l_y, h1),
                          preferred_element_type=jnp.float32)              # (c, l_x, h1)

        # ---- x half of the split first layer: once per batch element ----
        x_fc = jnp.dot(x, w1_top_ref[...],
                       preferred_element_type=jnp.float32)                 # (l_x, h1)
        h = _softplus(y_fc + x_fc[None] + b1_ref[...])                     # implicit bcast
        h = h.reshape(c_blk * l_x, h1)                                     # f32

        # ---- middle MLP layers (operands in compute dtype, f32 accumulation) ----
        for i in range(num_linear - 2):
            w = mid[2 * i][...]
            b = mid[2 * i + 1][...]
            h = _softplus(jnp.dot(h.astype(cdt), w,
                                  preferred_element_type=jnp.float32) + b)

        # ---- final 1-unit layer on VPU + fused sum over l_x tokens ----
        weighted = h * w_last_ref[...]                                     # (c*l_x, h_last)
        per_tok = jnp.sum(weighted.reshape(c_blk, l_x, -1), axis=-1)       # (c, l_x)
        scores = jnp.sum(per_tok, axis=-1, keepdims=True) \
            + jnp.float32(l_x) * b_last_ref[...]                           # (c, 1)
        o_ref[...] = jnp.transpose(scores).reshape(1, 1, 1, c_blk).astype(o_ref.dtype)

    return kernel


def _valid_c_blocks(C, l_y):
    """Candidate-tile sizes that divide C and keep the y block sublane-aligned."""
    vals = []
    for cb in range(1, C + 1):
        if C % cb == 0 and (cb == C or (cb * l_y) % 8 == 0):
            vals.append(cb)
    return vals


def mlp_with_som_forward(xs, ys, params, *, c_block=None, vmem_limit_bytes=None,
                         y_buffers=None):
    """xs: (bsz, l_x, d), ys: (bsz, C, l_y, d), params: list of (W (out,in), b (out,)).

    c_block: candidates per grid step (must divide C; if < C, c_block*l_y must be a
    multiple of 8).  Default is derived from the per-generation VMEM budget.
    y_buffers: optional pipeline depth for the y stream (e.g. 3 on v5e if DMA is
    exposed); default leaves Pallas' double buffering.
    Returns float32 scores of shape (bsz, C).
    """
    bsz, l_x, d = xs.shape
    _, C, l_y, _ = ys.shape
    cdt = xs.dtype
    num_linear = len(params)
    assert num_linear >= 2
    assert params[0][0].shape[1] == 2 * d

    # ---- per-generation VMEM budget ----
    try:
        vmem_cap = pltpu.get_tpu_info().vmem_capacity_bytes
    except Exception:
        vmem_cap = None
    if vmem_limit_bytes is None:
        if vmem_cap is None:
            vmem_limit_bytes = 32 * 1024 * 1024           # safe everywhere
        elif vmem_cap <= 64 * 1024 * 1024:                # v7x-class: 64 MiB / TC
            vmem_limit_bytes = 40 * 1024 * 1024
        else:                                             # v5e / v6e: 128 MiB
            vmem_limit_bytes = 100 * 1024 * 1024
    vmem_limit_bytes = int(vmem_limit_bytes)

    # ---- host-side parameter prep (weights in compute dtype, biases f32) ----
    w1, b1 = params[0]
    w1t = jnp.asarray(w1).T                               # (2d, h1)
    flat = [
        w1t[:d].astype(cdt),                              # W1 half applied to x
        w1t[d:].astype(cdt),                              # W1 half applied to gathered y
        jnp.asarray(b1, jnp.float32).reshape(1, -1),
    ]
    for (w, b) in params[1:-1]:
        flat.append(jnp.asarray(w).T.astype(cdt))
        flat.append(jnp.asarray(b, jnp.float32).reshape(1, -1))
    wl, bl = params[-1]
    flat.append(jnp.asarray(wl, jnp.float32).reshape(1, -1))   # final layer -> VPU row vec
    flat.append(jnp.asarray(bl, jnp.float32).reshape(1, 1))

    hidden = [p[0].shape[0] for p in params[:-1]]
    h1, h_max = hidden[0], max(hidden)
    itemsize = jnp.dtype(cdt).itemsize
    params_bytes = sum(int(a.size) * jnp.dtype(a.dtype).itemsize for a in flat)

    # ---- pick c_block from an explicit per-candidate VMEM formula ----
    if c_block is None:
        per_cand = (2 * l_y * d * itemsize                      # double-buffered y slab
                    + 4 * (4 * l_x * l_y                        # s/col/onehot (f32/i32)
                           + 2 * l_y * h1                       # yw1 (+ reshaped view)
                           + 4 * l_x * h_max))                  # y_fc / h / activations
        fixed = params_bytes + 2 * l_x * d * itemsize + (2 << 20)
        budget = int(vmem_limit_bytes * 0.85) - fixed
        cb_cap = max(1, budget // per_cand)
        valid = _valid_c_blocks(C, l_y)
        fit = [cb for cb in valid if cb <= cb_cap] or [valid[0]]
        # keep both v7x TensorCores busy: prefer a tiling whose grid has >= 2 steps.
        multi = [cb for cb in fit if bsz * (C // cb) >= 2]
        c_block = max(multi) if multi else max(fit)
    assert C % c_block == 0
    assert c_block == C or (c_block * l_y) % 8 == 0
    n_ct = C // c_block

    # Flatten candidates along the token axis so the kernel sees a 2-D y slab.
    ys2 = ys.reshape(bsz, C * l_y, d)

    y_spec_kwargs = {}
    if y_buffers is not None:
        y_spec_kwargs = dict(pipeline_mode=pl.Buffered(int(y_buffers)))
    in_specs = [
        # x is re-used across the candidate-tile axis via its index_map (no expand).
        pl.BlockSpec((1, l_x, d), lambda b, c: (b, 0, 0)),
        pl.BlockSpec((1, c_block * l_y, d), lambda b, c: (b, c, 0), **y_spec_kwargs),
    ]
    in_specs += [pl.BlockSpec(a.shape, lambda b, c: (0, 0)) for a in flat]

    kernel = make_som_mlp_kernel(num_linear, l_y)
    out = pl.pallas_call(
        kernel,
        out_shape=jax.ShapeDtypeStruct((bsz, n_ct, 1, c_block), jnp.float32),
        grid_spec=pltpu.PrefetchScalarGridSpec(
            num_scalar_prefetch=0,
            grid=(bsz, n_ct),
            in_specs=in_specs,
            out_specs=pl.BlockSpec((1, 1, 1, c_block), lambda b, c: (b, c, 0, 0)),
        ),
        compiler_params=pltpu.CompilerParams(
            dimension_semantics=("parallel", "parallel"),
            vmem_limit_bytes=vmem_limit_bytes,
        ),
    )(xs, ys2, *flat)

    # Scores stay in f32: they are sums over l_x tokens and bf16 truncation can
    # reorder close candidates.
    return out.reshape(bsz, C)


def ref_forward(xs, ys, params):
    """Pure-JAX reference mirroring the PyTorch forward (eval mode)."""
    bsz, l_x, d = xs.shape
    _, C, l_y, _ = ys.shape
    xse = jnp.broadcast_to(xs[:, None], (bsz, C, l_x, d)).reshape(-1, l_x, d)
    ysr = ys.reshape(-1, l_y, d)
    out = jnp.einsum('gxd,gyd->gxy', xse, ysr)
    amax = jnp.argmax(out, axis=-1)                               # (G, l_x)
    y_sel = jnp.take_along_axis(ysr, amax[..., None], axis=1)     # (G, l_x, d)
    h = jnp.concatenate([xse, y_sel], axis=-1)                    # flatten of stacked pair
    for i, (w, b) in enumerate(params):
        h = h @ w.T + b
        if i < len(params) - 1:
            h = _softplus(h)
    return jnp.sum(h[..., 0], axis=-1).reshape(bsz, C)


def init_params(key, input_size, mlp_layers):
    """Deterministic init mimicking nn.Linear (uniform(-1/sqrt(fan_in), 1/sqrt(fan_in)))."""
    dims = [input_size] + list(mlp_layers) + [1]
    params = []
    for i in range(len(dims) - 1):
        fan_in, fan_out = dims[i], dims[i + 1]
        key, k1, k2 = jax.random.split(key, 3)
        bound = 1.0 / (fan_in ** 0.5)
        w = jax.random.uniform(k1, (fan_out, fan_in), jnp.float32, -bound, bound)
        b = jax.random.uniform(k2, (fan_out,), jnp.float32, -bound, bound)
        params.append((w, b))
    return params


if __name__ == "__main__":
    # Small synthetic shapes (real module uses d=768/1024 -> input_size=2*d).
    bsz, C, l_x, l_y, d = 2, 4, 8, 16, 32
    mlp_layers = [64, 32]          # args.mlp_layers = "64,32"
    input_size = 2 * d

    key = jax.random.PRNGKey(0)
    kx, ky, kp = jax.random.split(key, 3)
    xs = jax.random.normal(kx, (bsz, l_x, d), jnp.float32)
    ys = jax.random.normal(ky, (bsz, C, l_y, d), jnp.float32)
    params = init_params(kp, input_size, mlp_layers)

    expected = jax.block_until_ready(ref_forward(xs, ys, params))

    # Default (auto c_block == C here) and an explicit multi-tile path (c_block < C).
    scores = jax.block_until_ready(mlp_with_som_forward(xs, ys, params))
    assert scores.shape == (bsz, C)
    assert jnp.allclose(scores, expected, rtol=2e-3, atol=2e-3), (scores, expected)

    scores2 = jax.block_until_ready(mlp_with_som_forward(xs, ys, params, c_block=2))
    assert jnp.allclose(scores2, expected, rtol=2e-3, atol=2e-3), (scores2, expected)

    print("KERNEL_OK")
</pallas_src>

<mosaic_0001>
module attributes {stable_mosaic.version = 11 : i64} {
  func.func @kernel(%arg0: i32, %arg1: i32, %arg2: memref<1x8x32xf32, #tpu.memory_space<vmem>>, %arg3: memref<1x64x32xf32, #tpu.memory_space<vmem>>, %arg4: memref<32x64xf32, #tpu.memory_space<vmem>>, %arg5: memref<32x64xf32, #tpu.memory_space<vmem>>, %arg6: memref<1x64xf32, #tpu.memory_space<vmem>>, %arg7: memref<64x32xf32, #tpu.memory_space<vmem>>, %arg8: memref<1x32xf32, #tpu.memory_space<vmem>>, %arg9: memref<1x32xf32, #tpu.memory_space<vmem>>, %arg10: memref<1x1xf32, #tpu.memory_space<vmem>>, %arg11: memref<1x1x1x4xf32, #tpu.memory_space<vmem>>) attributes {dimension_semantics = [#tpu.dimension_semantics<parallel>, #tpu.dimension_semantics<parallel>], iteration_bounds = array<i64: 2, 1>, scalar_prefetch = 0 : i64, scratch_operands = 0 : i64, tpu.core_type = #tpu.core_type<tc>, window_params = [{transform_indices = @transform_0, window_bounds = array<i64: 1, 8, 32>}, {transform_indices = @transform_1, window_bounds = array<i64: 1, 64, 32>}, {pipeline_mode = #tpu.pipeline_mode<synchronous>, transform_indices = @transform_2, window_bounds = array<i64: 32, 64>}, {pipeline_mode = #tpu.pipeline_mode<synchronous>, transform_indices = @transform_3, window_bounds = array<i64: 32, 64>}, {pipeline_mode = #tpu.pipeline_mode<synchronous>, transform_indices = @transform_4, window_bounds = array<i64: 1, 64>}, {pipeline_mode = #tpu.pipeline_mode<synchronous>, transform_indices = @transform_5, window_bounds = array<i64: 64, 32>}, {pipeline_mode = #tpu.pipeline_mode<synchronous>, transform_indices = @transform_6, window_bounds = array<i64: 1, 32>}, {pipeline_mode = #tpu.pipeline_mode<synchronous>, transform_indices = @transform_7, window_bounds = array<i64: 1, 32>}, {pipeline_mode = #tpu.pipeline_mode<synchronous>, transform_indices = @transform_8, window_bounds = array<i64: 1, 1>}, {transform_indices = @transform_9, window_bounds = array<i64: 1, 1, 1, 4>}]} {
    %c0 = arith.constant 0 : index
    %c0_0 = arith.constant 0 : index
    %c0_1 = arith.constant 0 : index
    %0 = vector.load %arg2[%c0, %c0_0, %c0_1] : memref<1x8x32xf32, #tpu.memory_space<vmem>>, vector<1x8x32xf32>
    %1 = vector.shape_cast %0 : vector<1x8x32xf32> to vector<8x32xf32>
    %c0_2 = arith.constant 0 : index
    %c0_3 = arith.constant 0 : index
    %c0_4 = arith.constant 0 : index
    %2 = vector.load %arg3[%c0_2, %c0_3, %c0_4] : memref<1x64x32xf32, #tpu.memory_space<vmem>>, vector<1x64x32xf32>
    %3 = vector.shape_cast %2 : vector<1x64x32xf32> to vector<64x32xf32>
    %cst = arith.constant dense<0.000000e+00> : vector<8x64xf32>
    %4 = tpu.matmul %1, %3, %cst {dimension_numbers = #tpu.dot_dimension_numbers<[1], [1], [0], [0], [0, 0, 1, 0], [], []>} : vector<8x32xf32>, vector<64x32xf32>, vector<8x64xf32> -> vector<8x64xf32>
    %5 = vector.shape_cast %4 : vector<8x64xf32> to vector<8x4x16xf32>
    %6 = tpu.transpose %5, [1, 0, 2] : vector<8x4x16xf32> -> vector<4x8x16xf32>
    %cst_5 = arith.constant dense<0xFF800000> : vector<4x8xf32>
    %7 = vector.multi_reduction <maximumf>, %6, %cst_5 [2] : vector<4x8x16xf32> to vector<4x8xf32>
    %8 = vector.shape_cast %7 : vector<4x8xf32> to vector<4x8x1xf32>
    %9 = tpu.iota {dimensions = array<i32: 2>} : vector<4x8x16xi32>
    %10 = vector.broadcast %8 : vector<4x8x1xf32> to vector<4x8x16xf32>
    %11 = arith.cmpf oge, %6, %10 : vector<4x8x16xf32>
    %c16_i32 = arith.constant 16 : i32
    %12 = vector.broadcast %c16_i32 : i32 to vector<4x8x16xi32>
    %13 = arith.select %11, %9, %12 : vector<4x8x16xi1>, vector<4x8x16xi32>
    %cst_6 = arith.constant dense<2147483647> : vector<4x8xi32>
    %14 = vector.multi_reduction <minsi>, %13, %cst_6 [2] : vector<4x8x16xi32> to vector<4x8xi32>
    %15 = vector.shape_cast %14 : vector<4x8xi32> to vector<4x8x1xi32>
    %16 = vector.broadcast %15 : vector<4x8x1xi32> to vector<4x8x16xi32>
    %17 = arith.cmpi eq, %9, %16 : vector<4x8x16xi32>
    %18 = arith.extui %17 : vector<4x8x16xi1> to vector<4x8x16xi32>
    %19 = arith.sitofp %18 : vector<4x8x16xi32> to vector<4x8x16xf32>
    %c0_7 = arith.constant 0 : index
    %c0_8 = arith.constant 0 : index
    %20 = vector.load %arg5[%c0_7, %c0_8] : memref<32x64xf32, #tpu.memory_space<vmem>>, vector<32x64xf32>
    %cst_9 = arith.constant dense<0.000000e+00> : vector<64x64xf32>
    %21 = tpu.matmul %3, %20, %cst_9 {dimension_numbers = #tpu.dot_dimension_numbers<[1], [0], [0], [1], [0, 0, 1, 1], [], []>} : vector<64x32xf32>, vector<32x64xf32>, vector<64x64xf32> -> vector<64x64xf32>
    %22 = vector.shape_cast %21 : vector<64x64xf32> to vector<4x16x64xf32>
    "tpu.trace_start"() <{level = 10 : i32, message = "cxy,cyh->cxh"}> : () -> ()
    %cst_10 = arith.constant dense<0.000000e+00> : vector<4x8x64xf32>
    %23 = tpu.matmul %19, %22, %cst_10 {dimension_numbers = #tpu.dot_dimension_numbers<[2], [1], [1], [2], [0, 0, 0, 1, 1, 2], [0], [0]>} : vector<4x8x16xf32>, vector<4x16x64xf32>, vector<4x8x64xf32> -> vector<4x8x64xf32>
    "tpu.trace_stop"() : () -> ()
    %c0_11 = arith.constant 0 : index
    %c0_12 = arith.constant 0 : index
    %24 = vector.load %arg4[%c0_11, %c0_12] : memref<32x64xf32, #tpu.memory_space<vmem>>, vector<32x64xf32>
    %cst_13 = arith.constant dense<0.000000e+00> : vector<8x64xf32>
    %25 = tpu.matmul %1, %24, %cst_13 {dimension_numbers = #tpu.dot_dimension_numbers<[1], [0], [0], [1], [0, 0, 1, 1], [], []>} : vector<8x32xf32>, vector<32x64xf32>, vector<8x64xf32> -> vector<8x64xf32>
    %26 = vector.shape_cast %25 : vector<8x64xf32> to vector<1x8x64xf32>
    %27 = vector.broadcast %26 : vector<1x8x64xf32> to vector<4x8x64xf32>
    %28 = arith.addf %23, %27 : vector<4x8x64xf32>
    %c0_14 = arith.constant 0 : index
    %c0_15 = arith.constant 0 : index
    %29 = vector.load %arg6[%c0_14, %c0_15] : memref<1x64xf32, #tpu.memory_space<vmem>>, vector<1x64xf32>
    %30 = vector.shape_cast %29 : vector<1x64xf32> to vector<1x1x64xf32>
    %31 = vector.broadcast %30 : vector<1x1x64xf32> to vector<4x8x64xf32>
    %32 = arith.addf %28, %31 : vector<4x8x64xf32>
    %cst_16 = arith.constant 2.000000e+01 : f32
    %33 = vector.broadcast %cst_16 : f32 to vector<4x8x64xf32>
    %34 = arith.cmpf ogt, %32, %33 : vector<4x8x64xf32>
    %cst_17 = arith.constant 2.000000e+01 : f32
    %35 = vector.broadcast %cst_17 : f32 to vector<4x8x64xf32>
    %36 = arith.minimumf %32, %35 : vector<4x8x64xf32>
    %37 = math.exp %36 : vector<4x8x64xf32>
    %38 = math.log1p %37 : vector<4x8x64xf32>
    %39 = arith.select %34, %32, %38 : vector<4x8x64xi1>, vector<4x8x64xf32>
    %40 = vector.shape_cast %39 : vector<4x8x64xf32> to vector<32x64xf32>
    %c0_18 = arith.constant 0 : index
    %c0_19 = arith.constant 0 : index
    %41 = vector.load %arg7[%c0_18, %c0_19] : memref<64x32xf32, #tpu.memory_space<vmem>>, vector<64x32xf32>
    %c0_20 = arith.constant 0 : index
    %c0_21 = arith.constant 0 : index
    %42 = vector.load %arg8[%c0_20, %c0_21] : memref<1x32xf32, #tpu.memory_space<vmem>>, vector<1x32xf32>
    %cst_22 = arith.constant dense<0.000000e+00> : vector<32x32xf32>
    %43 = tpu.matmul %40, %41, %cst_22 {dimension_numbers = #tpu.dot_dimension_numbers<[1], [0], [0], [1], [0, 0, 1, 1], [], []>} : vector<32x64xf32>, vector<64x32xf32>, vector<32x32xf32> -> vector<32x32xf32>
    %44 = vector.broadcast %42 : vector<1x32xf32> to vector<32x32xf32>
    %45 = arith.addf %43, %44 : vector<32x32xf32>
    %cst_23 = arith.constant 2.000000e+01 : f32
    %46 = vector.broadcast %cst_23 : f32 to vector<32x32xf32>
    %47 = arith.cmpf ogt, %45, %46 : vector<32x32xf32>
    %cst_24 = arith.constant 2.000000e+01 : f32
    %48 = vector.broadcast %cst_24 : f32 to vector<32x32xf32>
    %49 = arith.minimumf %45, %48 : vector<32x32xf32>
    %50 = math.exp %49 : vector<32x32xf32>
    %51 = math.log1p %50 : vector<32x32xf32>
    %52 = arith.select %47, %45, %51 : vector<32x32xi1>, vector<32x32xf32>
    %c0_25 = arith.constant 0 : index
    %c0_26 = arith.constant 0 : index
    %53 = vector.load %arg9[%c0_25, %c0_26] : memref<1x32xf32, #tpu.memory_space<vmem>>, vector<1x32xf32>
    %54 = vector.broadcast %53 : vector<1x32xf32> to vector<32x32xf32>
    %55 = arith.mulf %52, %54 : vector<32x32xf32>
    %56 = vector.shape_cast %55 : vector<32x32xf32> to vector<4x8x32xf32>
    %cst_27 = arith.constant dense<0.000000e+00> : vector<4x8xf32>
    %57 = vector.multi_reduction <add>, %56, %cst_27 [2] : vector<4x8x32xf32> to vector<4x8xf32>
    %cst_28 = arith.constant dense<0.000000e+00> : vector<4xf32>
    %58 = vector.multi_reduction <add>, %57, %cst_28 [1] : vector<4x8xf32> to vector<4xf32>
    %59 = vector.shape_cast %58 : vector<4xf32> to vector<4x1xf32>
    %c0_29 = arith.constant 0 : index
    %c0_30 = arith.constant 0 : index
    %60 = vector.load %arg10[%c0_29, %c0_30] : memref<1x1xf32, #tpu.memory_space<vmem>>, vector<1x1xf32>
    %cst_31 = arith.constant 8.000000e+00 : f32
    %61 = vector.broadcast %cst_31 : f32 to vector<1x1xf32>
    %62 = arith.mulf %61, %60 : vector<1x1xf32>
    %63 = vector.broadcast %62 : vector<1x1xf32> to vector<4x1xf32>
    %64 = arith.addf %59, %63 : vector<4x1xf32>
    %65 = tpu.transpose %64, [1, 0] : vector<4x1xf32> -> vector<1x4xf32>
    %66 = vector.shape_cast %65 : vector<1x4xf32> to vector<1x1x1x4xf32>
    %c0_32 = arith.constant 0 : index
    %c0_33 = arith.constant 0 : index
    %c0_34 = arith.constant 0 : index
    %c0_35 = arith.constant 0 : index
    %67 = vector.load %arg11[%c0_32, %c0_33, %c0_34, %c0_35] : memref<1x1x1x4xf32, #tpu.memory_space<vmem>>, vector<1x1x1x4xf32>
    tpu.vector_store %arg11[%c0_32, %c0_33, %c0_34, %c0_35], %66 {strides = array<i32>} : memref<1x1x1x4xf32, #tpu.memory_space<vmem>>, vector<1x1x1x4xf32>,
    return
  }
  func.func @transform_0(%arg0: i32, %arg1: i32) -> (i32, i32, i32) {
    %c0_i32 = arith.constant 0 : i32
    %c0_i32_0 = arith.constant 0 : i32
    %c0_i32_1 = arith.constant 0 : i32
    return %arg0, %c0_i32, %c0_i32_0 : i32, i32, i32
  }
  func.func @transform_1(%arg0: i32, %arg1: i32) -> (i32, i32, i32) {
    %c0_i32 = arith.constant 0 : i32
    %c0_i32_0 = arith.constant 0 : i32
    return %arg0, %arg1, %c0_i32 : i32, i32, i32
  }
  func.func @transform_2(%arg0: i32, %arg1: i32) -> (i32, i32) {
    %c0_i32 = arith.constant 0 : i32
    %c0_i32_0 = arith.constant 0 : i32
    %c0_i32_1 = arith.constant 0 : i32
    return %c0_i32, %c0_i32_0 : i32, i32
  }
  func.func @transform_3(%arg0: i32, %arg1: i32) -> (i32, i32) {
    %c0_i32 = arith.constant 0 : i32
    %c0_i32_0 = arith.constant 0 : i32
    %c0_i32_1 = arith.constant 0 : i32
    return %c0_i32, %c0_i32_0 : i32, i32
  }
  func.func @transform_4(%arg0: i32, %arg1: i32) -> (i32, i32) {
    %c0_i32 = arith.constant 0 : i32
    %c0_i32_0 = arith.constant 0 : i32
    %c0_i32_1 = arith.constant 0 : i32
    return %c0_i32, %c0_i32_0 : i32, i32
  }
  func.func @transform_5(%arg0: i32, %arg1: i32) -> (i32, i32) {
    %c0_i32 = arith.constant 0 : i32
    %c0_i32_0 = arith.constant 0 : i32
    %c0_i32_1 = arith.constant 0 : i32
    return %c0_i32, %c0_i32_0 : i32, i32
  }
  func.func @transform_6(%arg0: i32, %arg1: i32) -> (i32, i32) {
    %c0_i32 = arith.constant 0 : i32
    %c0_i32_0 = arith.constant 0 : i32
    %c0_i32_1 = arith.constant 0 : i32
    return %c0_i32, %c0_i32_0 : i32, i32
  }
  func.func @transform_7(%arg0: i32, %arg1: i32) -> (i32, i32) {
    %c0_i32 = arith.constant 0 : i32
    %c0_i32_0 = arith.constant 0 : i32
    %c0_i32_1 = arith.constant 0 : i32
    return %c0_i32, %c0_i32_0 : i32, i32
  }
  func.func @transform_8(%arg0: i32, %arg1: i32) -> (i32, i32) {
    %c0_i32 = arith.constant 0 : i32
    %c0_i32_0 = arith.constant 0 : i32
    %c0_i32_1 = arith.constant 0 : i32
    return %c0_i32, %c0_i32_0 : i32, i32
  }
  func.func @transform_9(%arg0: i32, %arg1: i32) -> (i32, i32, i32, i32) {
    %c0_i32 = arith.constant 0 : i32
    %c0_i32_0 = arith.constant 0 : i32
    %c0_i32_1 = arith.constant 0 : i32
    return %arg0, %arg1, %c0_i32, %c0_i32_0 : i32, i32, i32, i32
  }
}

</mosaic_0001>

<bundles_post_ra>
// kernel: tpu_custom_call.1
= control target key start
LH: loop header
LB: loop body
LE: loop exit
PB: predicated region body
PF: predicated region fallthrough
CT: control target
= control target key end

     0   :  { %s2371_s0 = inlined_call_operand.vmem [shape: f32[2,8,32], index: 0, kind: input, shape index: {}]   ;;  %s2372_s1 = inlined_call_operand.vmem [shape: f32[2,64,32], index: 1, kind: input, shape index: {}]   ;;  %s2373_s2 = inlined_call_operand.vmem [shape: f32[32,64], index: 2, kind: input, shape index: {}]   ;;  %s2374_s3 = inlined_call_operand.vmem [shape: f32[32,64], index: 3, kind: input, shape index: {}]   ;;  %s2375_s4 = inlined_call_operand.vmem [shape: f32[1,64], index: 4, kind: input, shape index: {}]   ;;  %s2376_s5 = inlined_call_operand.vmem [shape: f32[64,32], index: 5, kind: input, shape index: {}]   ;;  %s2377_s6 = inlined_call_operand.vmem [shape: f32[1,32], index: 6, kind: input, shape index: {}]   ;;  %s2378_s7 = inlined_call_operand.vmem [shape: f32[1,32], index: 7, kind: input, shape index: {}]   ;;  %s2379_s8 = inlined_call_operand.<no memory space> [shape: f32[1,1], index: 8, kind: input, shape index: {}]   ;;  %s2380_s9 = inlined_call_operand.hbm [shape: f32[2,1,1,4], index: 9, kind: output, shape index: {}]  }
   0x1   :  { %v14_v0 = vstv %s2379_s8 }
   0x2   :  { %15 = vst [vmem:[#allocation2] sm:$0x1] %v14_v0 }
   0x3   :  { %16 = vsyncpa [#allocation4], 0 }
   0x4   :  { %18 = vsyncpa [#allocation4 + $0x1], 0  ;;  %s2061_s11 = smov 0   ;;  %s2063_s12 = smov 0  }
   0x5   :  { %s2065_s13 = smov 0   ;;  %s2067_s14 = smov 0  }
   0x6   :  { %s2069_s15 = smov 0   ;;  %s2071_s16 = smov 0  }
   0x7 LB: > { %s1631_s8 = sadd.s32 4294967295, %s1998_s16   ;;  %s1632_s17 = sadd.s32 4294967294, %s1998_s16   ;;  %s1998_s16 = sphi %s2071_s16, %s24_s16   ;;  %s1994_s15 = sphi %s2069_s15, %s2387_s15   ;;  %s1990_s14 = sphi %s2067_s14, %s2386_s14   ;;  %s1986_s13 = sphi %s2065_s13, %s2385_s13   ;;  %s1982_s12 = sphi %s2063_s12, %s2384_s12   ;;  %s1978_s11 = sphi %s2061_s11, %s2383_s11  }
   0x8   : > { %s36_s18 = sadd.s32 1, %s1994_s15  ;;  %s246_s19 = sadd.s32 1, %s1986_s13 }
   0x9   : > { %p38_p0 = scmp.ge.s32.totalorder %s36_s18, 2  ;;  %p256_p1 = scmp.ne.s32.totalorder %s1986_s13, %s1982_s12 }
   0xa   : > { %p257_p2 = scmp.eq.s32.totalorder %s1631_s8, 1  ;;  %p262_p3 = scmp.ne.s32.totalorder %s1982_s12, %s1978_s11 }
   0xb   : > { %s2389_s18 = smov (%p38_p0, %s36_s18), 0  ;;  %p263_p5 = scmp.eq.s32.totalorder %s1632_s17, 1 }
   0xc   : > { %p2101_p4 = por %p257_p2, %p256_p1  ;;  %s241_s21 = ssub.s32 %s1994_s15, %s2389_s18 }
   0xd   : > { %p1635_p6 = scmp.ge.s32.totalorder %s1998_s16, 1  ;;  %p244_p7 = scmp.eq.s32.totalorder %s241_s21, 0 }
   0xe   : > { %p2108_p8 = por %p263_p5, %p262_p3  ;;  %p322_p9 = scmp.lt.s32.totalorder %s1998_s16, 3 }
   0xf   : > { %s2114_s23 = scalar_select %p244_p7, %s1986_s13, %s246_s19  }
  0x10   : > { %p323_p10 = pnand %p1635_p6, %p322_p9 }
  0x11   : > { %p365_p11 = scmp.lt.s32.totalorder (!%p323_p10), %s1990_s14, 1  ;;  %s2002_s17 = smov (!%p323_p10), 80  }
  0x12   : > { %326 = sbr.rel (%p323_p10) target bundleno = 1725 (0x6bd), region = 56  ;;  %s2003_s19 = smov (!%p323_p10), 112  }
  0x13   : > { %s2004_s21 = smov (!%p323_p10), 96   ;;  %s363_s26 = sand.u32 (!%p323_p10), 1, %s1982_s12  }
  0x14   : > { %s1674_s27 = sshll.u32 (!%p323_p10), %s1990_s14, 4 }
  0x17   : > { %v2000_v1 = vmov 0.0   ;;  %vm2001_vm0 = vmmov 0   ;;  %s2121_s24 = scalar_select %p365_p11, %s1990_s14, 1  ;;  %vm388_vm1 = vcmask 261120   ;;  %v2005_v13 = vmov 1983009808  }
  0x18   : > { %1728 = vmatprep.subr.mxu0 %v2000_v1  ;;  %1744 = vmatprep.mubr.msk.f32.mxu0 %vm2001_vm0, %v2000_v1  ;;  %v499_v14 = vunpack.c.l.s4 %v2005_v13  ;;  %v501_v15 = vlaneseq  ;;  %v2006_v16 = vmov 1934713408   ;;  %vm632_vm2 = vcmask 130048   ;;  %v728_v13 = vld [vmem:[%s2374_s3 + $0x8] sm:$0xff] }
  0x19   : > { %s1677_s25 = sshll.u32 %s2121_s24, 6  ;;  %s1636_s29 = sshll.u32 %s2121_s24, 3  ;;  %v531_v17 = vunpack.c.l.s4 %v2006_v16 }
  0x1a   : > { %s377_s28 = scalar_lea.vmem %s2372_s1, %s1677_s25  ;;  %s368_s8 = scalar_lea.vmem %s2371_s0, %s1636_s29  ;;  %v500_v18 = vunpack.c.0.s8 %v499_v14  ;;  %v2173_v19 = vshrl.u32 %v501_v15, 7  ;;  %v727_v14 = vld [vmem:[%s2374_s3] sm:$0xff] }
  0x1b   : > { %v2127_v2 = vld [vmem:[%s377_s28 + $0x38] sm:$0xff]  ;;  %v2132_v3 = vld [vmem:[%s377_s28 + $0x30] sm:$0xff]  ;;  %v380_v4 = vld [vmem:[%s377_s28] sm:$0xff]  ;;  %v532_v22 = vunpack.c.0.s8 %v531_v17 }
  0x1c   : > { %1729 = vmatpush3.xpose.msk.msra.mxu0 %vm388_vm1, %v2127_v2  ;;  %1755 = vmatprep.mubr.msk.f32.mxu1 %vm388_vm1, %v380_v4  ;;  %v2138_v5 = vld [vmem:[%s377_s28 + $0x28] sm:$0xff]  ;;  %v2143_v6 = vld [vmem:[%s377_s28 + $0x20] sm:$0xff]  ;;  %v2148_v7 = vld [vmem:[%s377_s28 + $0x18] sm:$0xff]  ;;  %v503_v23 = vsub.s32 %v500_v18, %v2173_v19 }
  0x1d   : > { %1730 = vmatprep.subr.mxu0 %v2000_v1  ;;  %v2153_v8 = vld [vmem:[%s377_s28 + $0x10] sm:$0xff]  ;;  %v2158_v9 = vld [vmem:[%s377_s28 + $0x8] sm:$0xff]  ;;  %v2168_v10 = vld [vmem:[%s368_s8] sm:$0xff]  ;;  %v535_v29 = vsub.s32 %v532_v22, %v2173_v19  ;;  %s364_s28 = scalar_lea.vmem [#allocation3], %s363_s26  ;;  %s2331_s8 = scalar_lea.hbm %s2380_s9, %s1674_s27 }
  0x1e   : > { %s1549_s29 = sshll.u32 %s364_s28, 4  ;;  %s1550_s29 = int_to_ptr.vmem [resolvable:$true] %s1549_s29 }
  0x20   : > { %1731 = vmatpush3.xpose.msk.msra.mxu0 %vm388_vm1, %v2132_v3 }
  0x21   : > { %1732 = vmatprep.subr.mxu0 %v2000_v1 }
  0x24   : > { %1733 = vmatpush3.xpose.msk.msra.mxu0 %vm388_vm1, %v2138_v5 }
  0x25   : > { %1734 = vmatprep.subr.mxu0 %v2000_v1 }
  0x28   : > { %1735 = vmatpush3.xpose.msk.msra.mxu0 %vm388_vm1, %v2143_v6 }
  0x29   : > { %1736 = vmatprep.subr.mxu0 %v2000_v1 }
  0x2c   : > { %1737 = vmatpush3.xpose.msk.msra.mxu0 %vm388_vm1, %v2148_v7 }
  0x2d   : > { %1738 = vmatprep.subr.mxu0 %v2000_v1 }
  0x30   : > { %1739 = vmatpush3.xpose.msk.msra.mxu0 %vm388_vm1, %v2153_v8 }
  0x31   : > { %1740 = vmatprep.subr.mxu0 %v2000_v1 }
  0x34   : > { %1741 = vmatpush3.xpose.msk.msra.mxu0 %vm388_vm1, %v2158_v9 }
  0x35   : > { %1742 = vmatprep.subr.mxu0 %v2000_v1 }
  0x38   : > { %1743 = vmatpush3.xpose.msk.msra.mxu0 %vm388_vm1, %v380_v4 }
  0x3b   : > { %1745 = vmatmul.mubr.msk.f32.vlgmr.msra.gmra.mxu0 %vm388_vm1, %v2168_v10 }
  0xfb   : > { %v482_v11 = vpop.f32.mrf.mxu0 }
  0xfc   : > { %493 = vrot.lane.b32.xlu1 %v482_v11, %s2002_s17  ;;  %487 = vrot.lane.b32.xlu0 %v482_v11, %s2003_s19  ;;  %s1536_s17 = scalar_lea.sflag [#allocation4], %s363_s26  ;;  %s1922_s19 = scalar_lea.vmem %s1550_s29, 16 }
  0xfd   : > { %v1746_v12 = vpop.f32.mrf.mxu0  ;;  %p1923_p12 = scmp.ne.s32.totalorder %s1550_s29, %s1922_s19 }
  0xfe   : > { %v729_v12 = vld [vmem:[%s2374_s3 + $0x10] sm:$0xff] }
  0xff   : > { %p1924_p13 = pnand %p1923_p12, %p2101_p4 }
 0x100   : > { %490 = vrot.lane.b32.xlu0 %v482_v11, %s2004_s21  ;;  %s2007_s21 = smov [#allocation3]  }
 0x101   : > { %p1925_p0 = pneg %p1924_p13  ;;  %s1926_s24 = sshll.u32 %s2007_s21, 4  ;;  %s1927_s24 = int_to_ptr.vmem [resolvable:$false] %s1926_s24 }
 0x102   : > { %s1928_s14 = scalar_lea.vmem %s1927_s24, 32  ;;  %p1929_p1 = scmp.lt.s32.totalorder %s1550_s29, %s1927_s24 }
 0x103   : > { %p1930_p2 = scmp.lt.s32.totalorder %s1928_s14, %s1922_s19 }
 0x105   : > { %p1931_p3 = por %p1930_p2, %p1929_p1 }
 0x107   : > { %p1932_p5 = pnand %p1931_p3, %p1925_p0 }
 0x16e   : > { %v494_v20 = vpop.permute.xlu1 %493  ;;  %v488_v21 = vpop.permute.xlu0 %487 }
 0x16f   : > { %v512_v24 = vcombine.low %v488_v21, %v494_v20  ;;  %v513_v25 = vcombine.high %v488_v21, %v494_v20 }
 0x171   : > { %v520_v30 = vrot.slane %v512_v24, %v503_v23  ;;  %v527_v31 = vrot.slane %v513_v25, %v503_v23 }
 0x172   : > { %v491_v26 = vpop.permute.xlu0 %490 }
 0x173   : > { %v496_v27 = vcombine.low %v482_v11, %v491_v26  ;;  %v497_v28 = vcombine.high %v482_v11, %v491_v26  ;;  %v730_v11 = vld [vmem:[%s2374_s3 + $0x18] sm:$0xff] }
 0x174   : > { %1747 = vmatprep.subr.mxu1 %v730_v11 }
 0x175   : > { %v504_v32 = vrot.slane %v496_v27, %v503_v23  ;;  %v511_v33 = vrot.slane %v497_v28, %v503_v23  ;;  %1748 = vmatpush3.msra.mxu1 %v730_v11 }
 0x176   : > { %1749 = vmatprep.subr.mxu1 %v729_v12 }
 0x177   : > { %v528_v34 = vcombine.low %v504_v32, %v520_v30  ;;  %v529_v35 = vcombine.high %v504_v32, %v520_v30  ;;  %v544_v36 = vcombine.low %v511_v33, %v527_v31  ;;  %v545_v37 = vcombine.high %v511_v33, %v527_v31  ;;  %1750 = vmatpush3.msra.mxu1 %v729_v12  ;;  %v839_v30 = vld [vmem:[%s2373_s2 + $0x18] sm:$0xff]  ;;  %v838_v31 = vld [vmem:[%s2373_s2 + $0x10] sm:$0xff]  ;;  %v837_v32 = vld [vmem:[%s2373_s2 + $0x8] sm:$0xff] }
 0x178   : > { %1751 = vmatprep.subr.mxu1 %v728_v13  ;;  %v836_v33 = vld [vmem:[%s2373_s2] sm:$0xff] }
 0x179   : > { %v536_v38 = vrot.slane %v528_v34, %v535_v29  ;;  %v543_v39 = vrot.slane %v529_v35, %v535_v29  ;;  %v552_v40 = vrot.slane %v544_v36, %v535_v29  ;;  %v559_v41 = vrot.slane %v545_v37, %v535_v29  ;;  %1752 = vmatpush3.msra.mxu1 %v728_v13 }
 0x17a   : > { %1753 = vmatprep.subr.mxu1 %v727_v14 }
 0x17b   : > { %v564_v42 = vcombine.low %v536_v38, %v543_v39  ;;  %v1648_v43 = vcombine.high %v536_v38, %v543_v39  ;;  %v580_v44 = vcombine.low %v552_v40, %v559_v41  ;;  %v1649_v45 = vcombine.high %v552_v40, %v559_v41  ;;  %1754 = vmatpush3.msra.mxu1 %v727_v14 }
 0x17c   : > { %1756 = vmatmul.mubr.msk.f32.vlgmr.msra.gmra.mxu1 %vm388_vm1, %v2158_v9  ;;  %1767 = vmatprep.subr.mxu1 %v2000_v1 }
 0x17d   : > { %v571_v46 = vrot.slane %v564_v42, %v503_v23  ;;  %v579_v47 = vrot.slane %v1648_v43, %v503_v23  ;;  %v587_v48 = vrot.slane %v580_v44, %v503_v23  ;;  %v595_v49 = vrot.slane %v1649_v45, %v503_v23  ;;  %1758 = vmatprep.mubr.msk.f32.mxu1 %vm388_vm1, %v2153_v8 }
 0x17e   : > { %v2211_v8 = vand.u32 127, %v501_v15  ;;  %1768 = vmatpush3.msra.mxu1 %v839_v30 }
 0x17f   : > { %v596_v50 = vcombine.low %v571_v46, %v579_v47  ;;  %v612_v51 = vcombine.low %v587_v48, %v595_v49  ;;  %v597_v52 = vcombine.high %v571_v46, %v579_v47  ;;  %v613_v53 = vcombine.high %v587_v48, %v595_v49  ;;  %1769 = vmatprep.subr.mxu1 %v2000_v1 }
 0x180   : > { %1759 = vmatmul.mubr.msk.f32.gmra.mxu1 %vm388_vm1, %v2148_v7 }
 0x181   : > { %v604_v54 = vrot.slane %v596_v50, %v535_v29  ;;  %v620_v55 = vrot.slane %v612_v51, %v535_v29  ;;  %v611_v56 = vrot.slane %v597_v52, %v535_v29  ;;  %v627_v57 = vrot.slane %v613_v53, %v535_v29  ;;  %1761 = vmatprep.mubr.msk.f32.mxu1 %vm388_vm1, %v2143_v6 }
 0x182   : > { %1770 = vmatpush3.msra.mxu1 %v838_v31  ;;  %v1667_v31 = vld [vmem:[%s2375_s4] ss:$0 sm:$0xff] }
 0x183   : > { %v629_v58 = vcombine.high %v604_v54, %v620_v55  ;;  %v628_v59 = vcombine.low %v604_v54, %v620_v55  ;;  %v630_v62 = vcombine.low %v611_v56, %v627_v57  ;;  %v631_v63 = vcombine.high %v611_v56, %v627_v57  ;;  %1771 = vmatprep.subr.mxu1 %v2000_v1 }
 0x184   : > { %1762 = vmatmul.mubr.msk.f32.gmra.mxu1 %vm388_vm1, %v2138_v5 }
 0x185   : > { %v636_v60 = vsel %vm632_vm2, %v629_v58, -inf  ;;  %v633_v61 = vsel %vm632_vm2, %v628_v59, -inf  ;;  %v639_v0 = vsel %vm632_vm2, %v630_v62, -inf  ;;  %v642_v4 = vsel %vm632_vm2, %v631_v63, -inf  ;;  %1764 = vmatprep.mubr.msk.f32.mxu1 %vm388_vm1, %v2132_v3  ;;  %1772 = vmatpush3.msra.mxu1 %v837_v32 }
 0x186   : > { %637 = vmax.xlane.f32.xlu0 %v636_v60  ;;  %634 = vmax.xlane.f32.xlu1 %v633_v61 }
 0x187   : > { %1773 = vmatprep.subr.mxu1 %v2000_v1 }
 0x188   : > { %1765 = vmatmul.mubr.msk.f32.gmra.mxu1 %vm388_vm1, %v2127_v2 }
 0x189   : > { %1775 = vmatprep.mubr.msk.f32.mxu1 %vm2001_vm0, %v2000_v1  ;;  %1774 = vmatpush3.msra.mxu1 %v836_v33 }
 0x18a   : > { %640 = vmax.xlane.f32.xlu0 %v639_v0  ;;  %643 = vmax.xlane.f32.xlu1 %v642_v4 }
 0x18b   : > { %1778 = vmatprep.subr.mxu1 %v2000_v1 }
 0x18c   : > { %1776 = vmatmul.mubr.msk.f32.vlgmr.msra.gmra.mxu1 %vm388_vm1, %v2168_v10 }
 0x18d   : > { %1782 = vmatprep.mubr.msk.f32.mxu1 %vm2001_vm0, %v2000_v1 }
 0x20f   : > { %v638_v9 = vpop.xlane.xlu0 %637  ;;  %v635_v7 = vpop.xlane.xlu1 %634 }
 0x210   : > { %vm648_vm3 = vcmp.ge.f32.partialorder %v629_v58, %v638_v9  ;;  %vm647_vm4 = vcmp.ge.f32.partialorder %v628_v59, %v635_v7 }
 0x211   : > { %v652_v6 = vsel %vm648_vm3, %v2211_v8, 16  ;;  %v651_v5 = vsel %vm647_vm4, %v2211_v8, 16 }
 0x212   : > { %v670_v16 = vsel %vm632_vm2, %v652_v6, 2147483647  ;;  %v655_v3 = vsel %vm632_vm2, %v651_v5, 2147483647 }
 0x213   : > { %v641_v17 = vpop.xlane.xlu0 %640  ;;  %v644_v2 = vpop.xlane.xlu1 %643  ;;  %v672_v18 = vshra.s32 %v670_v16, 16  ;;  %v657_v20 = vshra.s32 %v655_v3, 16  ;;  %v656_v35 = vand.u32 65535, %v655_v3  ;;  %v671_v36 = vand.u32 65535, %v670_v16 }
 0x214   : > { %vm649_vm5 = vcmp.ge.f32.partialorder %v630_v62, %v641_v17  ;;  %vm650_vm6 = vcmp.ge.f32.partialorder %v631_v63, %v644_v2 }
 0x215   : > { %v653_v15 = vsel %vm649_vm5, %v2211_v8, 16  ;;  %v654_v21 = vsel %vm650_vm6, %v2211_v8, 16  ;;  %v674_v22 = vcvt.s32.f32 %v672_v18  ;;  %v659_v23 = vcvt.s32.f32 %v657_v20 }
 0x216   : > { %v685_v24 = vsel %vm632_vm2, %v653_v15, 2147483647  ;;  %v700_v25 = vsel %vm632_vm2, %v654_v21, 2147483647  ;;  %v658_v39 = vcvt.s32.f32 %v656_v35  ;;  %v673_v40 = vcvt.s32.f32 %v671_v36 }
 0x217   : > { %675 = vmin.xlane.f32.xlu1 %v674_v22  ;;  %660 = vmin.xlane.f32.xlu0 %v659_v23  ;;  %v687_v26 = vshra.s32 %v685_v24, 16  ;;  %v702_v27 = vshra.s32 %v700_v25, 16  ;;  %v686_v41 = vand.u32 65535, %v685_v24  ;;  %v701_v42 = vand.u32 65535, %v700_v25  ;;  %v1275_v24 = vld [vmem:[%s2376_s5 + $0x30] sm:$0xff]  ;;  %v1274_v25 = vld [vmem:[%s2376_s5 + $0x28] sm:$0xff] }
 0x219   : > { %v689_v28 = vcvt.s32.f32 %v687_v26  ;;  %v704_v29 = vcvt.s32.f32 %v702_v27  ;;  %v688_v46 = vcvt.s32.f32 %v686_v41  ;;  %v703_v47 = vcvt.s32.f32 %v701_v42  ;;  %v1272_v26 = vld [vmem:[%s2376_s5 + $0x18] sm:$0xff]  ;;  %v1271_v27 = vld [vmem:[%s2376_s5 + $0x10] sm:$0xff] }
 0x21b   : > { %690 = vmin.xlane.f32.xlu0 %v689_v28  ;;  %705 = vmin.xlane.f32.xlu1 %v704_v29 }
 0x23c   : > { %v1757_v34 = vpop.f32.mrf.mxu1 }
 0x23d   : > { %1779 = vmatpush3.msra.mxu1 %v1757_v34 }
 0x23e   : > { %1780 = vmatprep.subr.mxu1 %v2000_v1  ;;  %v797_v50 = vpop.f32.mrf.mxu1 }
 0x23f   : > { %1781 = vmatpush3.msra.mxu1 %v797_v50 }
 0x240   : > { %1785 = vmatprep.subr.mxu1 %v2000_v1  ;;  %v1760_v51 = vpop.f32.mrf.mxu1 }
 0x242   : > { %v807_v52 = vpop.f32.mrf.mxu1 }
 0x244   : > { %v1763_v53 = vpop.f32.mrf.mxu1 }
 0x246   : > { %v817_v54 = vpop.f32.mrf.mxu1 }
 0x248   : > { %v1766_v55 = vpop.f32.mrf.mxu1 }
 0x24a   : > { %v827_v56 = vpop.f32.mrf.mxu1 }
 0x24c   : > { %v2243_v57 = vpop.f32.mrf.mxu1 }
 0x24e   : > { %v1777_v58 = vpop.f32.mrf.mxu1 }
 0x2a0   : > { %v661_v37 = vpop.xlane.xlu0 %660  ;;  %v676_v38 = vpop.xlane.xlu1 %675 }
 0x2a1   : > { %vm662_vm7 = vcmp.eq.f32.partialorder %v659_v23, %v661_v37  ;;  %vm677_vm8 = vcmp.eq.f32.partialorder %v674_v22, %v676_v38  ;;  %v667_v59 = vcvt.f32.s32 %v661_v37  ;;  %v682_v60 = vcvt.f32.s32 %v676_v38  ;;  %v1276_v23 = vld [vmem:[%s2376_s5 + $0x38] sm:$0xff] }
 0x2a2   : > { %v663_v43 = vsel %vm662_vm7, %v658_v39, inf  ;;  %v678_v44 = vsel %vm677_vm8, %v673_v40, inf  ;;  %1806 = vmatprep.subr.mxu0 %v1276_v23 }
 0x2a3   : > { %664 = vmin.xlane.f32.xlu0 %v663_v43  ;;  %679 = vmin.xlane.f32.xlu1 %v678_v44  ;;  %v668_v61 = vshll.u32 %v667_v59, 16  ;;  %v683_v0 = vshll.u32 %v682_v60, 16 }
 0x2a4   : > { %v691_v10 = vpop.xlane.xlu0 %690  ;;  %v706_v45 = vpop.xlane.xlu1 %705  ;;  %1807 = vmatpush3.msra.mxu0 %v1276_v23 }
 0x2a5   : > { %vm692_vm9 = vcmp.eq.f32.partialorder %v689_v28, %v691_v10  ;;  %vm707_vm10 = vcmp.eq.f32.partialorder %v704_v29, %v706_v45  ;;  %v697_v4 = vcvt.f32.s32 %v691_v10  ;;  %v712_v5 = vcvt.f32.s32 %v706_v45  ;;  %1808 = vmatprep.subr.mxu0 %v1275_v24  ;;  %v1270_v28 = vld [vmem:[%s2376_s5 + $0x8] sm:$0xff]  ;;  %v1269_v29 = vld [vmem:[%s2376_s5] sm:$0xff] }
 0x2a6   : > { %v693_v48 = vsel %vm692_vm9, %v688_v46, inf  ;;  %v708_v49 = vsel %vm707_vm10, %v703_v47, inf  ;;  %1809 = vmatpush3.msra.mxu0 %v1275_v24 }
 0x2a7   : > { %694 = vmin.xlane.f32.xlu0 %v693_v48  ;;  %709 = vmin.xlane.f32.xlu1 %v708_v49  ;;  %v698_v6 = vshll.u32 %v697_v4, 16  ;;  %v713_v18 = vshll.u32 %v712_v5, 16 }
 0x2a8   : > { %1810 = vmatprep.subr.mxu0 %v1274_v25 }
 0x2a9   : > { %1811 = vmatpush3.msra.mxu0 %v1274_v25 }
 0x32c   : > { %v665_v62 = vpop.xlane.xlu0 %664  ;;  %v680_v63 = vpop.xlane.xlu1 %679 }
 0x32d   : > { %v666_v11 = vcvt.f32.s32 %v665_v62  ;;  %v681_v12 = vcvt.f32.s32 %v680_v63 }
 0x32f   : > { %v669_v13 = vadd.s32 %v668_v61, %v666_v11  ;;  %v684_v14 = vadd.s32 %v683_v0, %v681_v12 }
 0x330   : > { %v695_v9 = vpop.xlane.xlu0 %694  ;;  %v710_v7 = vpop.xlane.xlu1 %709 }
 0x331   : > { %vm715_vm11 = vcmp.eq.s32.totalorder %v2211_v8, %v669_v13  ;;  %v696_v16 = vcvt.f32.s32 %v695_v9  ;;  %vm716_vm12 = vcmp.eq.s32.totalorder %v2211_v8, %v684_v14  ;;  %v711_v2 = vcvt.f32.s32 %v710_v7 }
 0x332   : > { %v1650_v3 = vsel %vm715_vm11, 1.0, %v2000_v1  ;;  %v1651_v20 = vsel %vm716_vm12, 1.0, %v2000_v1 }
 0x333   : > { %v699_v17 = vadd.s32 %v698_v6, %v696_v16  ;;  %1783 = vmatmul.mubr.msk.f32.vlgmr.msra.gmra.mxu1 %vm632_vm2, %v1650_v3  ;;  %v714_v15 = vadd.s32 %v713_v18, %v711_v2 }
 0x334   : > { %1786 = vmatpush3.msra.mxu1 %v1760_v51  ;;  %1789 = vmatprep.mubr.msk.f32.mxu1 %vm2001_vm0, %v2000_v1 }
 0x335   : > { %1787 = vmatprep.subr.mxu1 %v2000_v1  ;;  %vm717_vm13 = vcmp.eq.s32.totalorder %v2211_v8, %v699_v17  ;;  %vm718_vm14 = vcmp.eq.s32.totalorder %v2211_v8, %v714_v15 }
 0x336   : > { %1788 = vmatpush3.msra.mxu1 %v807_v52  ;;  %v1652_v21 = vsel %vm717_vm13, 1.0, %v2000_v1  ;;  %v1653_v22 = vsel %vm718_vm14, 1.0, %v2000_v1 }
 0x337   : > { %1792 = vmatprep.subr.mxu1 %v2000_v1  ;;  %1790 = vmatmul.mubr.msk.f32.vlgmr.msra.gmra.mxu1 %vm632_vm2, %v1651_v20 }
 0x338   : > { %1793 = vmatpush3.msra.mxu1 %v1763_v53  ;;  %1796 = vmatprep.mubr.msk.f32.mxu1 %vm2001_vm0, %v2000_v1 }
 0x339   : > { %1794 = vmatprep.subr.mxu1 %v2000_v1 }
 0x33a   : > { %1795 = vmatpush3.msra.mxu1 %v817_v54 }
 0x33b   : > { %1799 = vmatprep.subr.mxu1 %v2000_v1  ;;  %1797 = vmatmul.mubr.msk.f32.vlgmr.msra.gmra.mxu1 %vm632_vm2, %v1652_v21 }
 0x33c   : > { %1800 = vmatpush3.msra.mxu1 %v1766_v55  ;;  %1803 = vmatprep.mubr.msk.f32.mxu1 %vm2001_vm0, %v2000_v1  ;;  %vm1284_vm0 = vcmask 523264  }
 0x33d   : > { %1801 = vmatprep.subr.mxu1 %v2000_v1  ;;  %v1273_v1 = vld [vmem:[%s2376_s5 + $0x20] sm:$0xff] }
 0x33e   : > { %1802 = vmatpush3.msra.mxu1 %v827_v56  ;;  %1812 = vmatprep.subr.mxu0 %v1273_v1 }
 0x33f   : > { %1804 = vmatmul.mubr.msk.f32.vlgmr.msra.gmra.mxu1 %vm632_vm2, %v1653_v22  ;;  %1813 = vmatpush3.msra.mxu0 %v1273_v1 }
 0x340   : > { %1814 = vmatprep.subr.mxu0 %v1272_v26 }
 0x341   : > { %1815 = vmatpush3.msra.mxu0 %v1272_v26 }
 0x342   : > { %1816 = vmatprep.subr.mxu0 %v1271_v27 }
 0x343   : > { %1817 = vmatpush3.msra.mxu0 %v1271_v27 }
 0x344   : > { %1818 = vmatprep.subr.mxu0 %v1270_v28 }
 0x345   : > { %1819 = vmatpush3.msra.mxu0 %v1270_v28 }
 0x346   : > { %1820 = vmatprep.subr.mxu0 %v1269_v29 }
 0x347   : > { %1821 = vmatpush3.msra.mxu0 %v1269_v29 }
 0x3f3   : > { %v979_v30 = vpop.f32.mrf.mxu1 }
 0x3f4   : > { %v980_v32 = vadd.f32 %v979_v30, %v2243_v57 }
 0x3f5   : > { %v1784_v33 = vpop.f32.mrf.mxu1 }
 0x3f6   : > { %v1209_v34 = vadd.f32 %v1667_v31, %v980_v32  ;;  %v1668_v33 = vld [vmem:[%s2377_s6] ss:$0 sm:$0xff] }
 0x3f7   : > { %v1052_v35 = vpop.f32.mrf.mxu1 }
 0x3f8   : > { %v1217_v36 = vmin.f32 %v1209_v34, 20.0  ;;  %v1053_v37 = vadd.f32 %v1052_v35, %v2243_v57  ;;  %vm1213_vm2 = vcmp.gt.f32.partialorder %v1209_v34, 20.0 }
 0x3f9   : > { %v1791_v38 = vpop.f32.mrf.mxu1 }
 0x3fa   : > { %v1221_v39 = vmul.f32 1.442695, %v1217_v36  ;;  %v1210_v40 = vadd.f32 %v1667_v31, %v1053_v37 }
 0x3fb   : > { %v1125_v41 = vpop.f32.mrf.mxu1 }
 0x3fc   : > { %1890 = vpow2.f32 %v1221_v39  ;;  %v1218_v42 = vmin.f32 %v1210_v40, 20.0  ;;  %v1126_v43 = vadd.f32 %v1125_v41, %v2243_v57  ;;  %vm1214_vm4 = vcmp.gt.f32.partialorder %v1210_v40, 20.0 }
 0x3fd   : > { %v1798_v44 = vpop.f32.mrf.mxu1 }
 0x3fe   : > { %v1223_v10 = vmul.f32 1.442695, %v1218_v42  ;;  %v1211_v45 = vadd.f32 %v1667_v31, %v1126_v43 }
 0x3ff   : > { %v1198_v46 = vpop.f32.mrf.mxu1 }
 0x400   : > { %1892 = vpow2.f32 %v1223_v10  ;;  %v1219_v47 = vmin.f32 %v1211_v45, 20.0  ;;  %v1199_v48 = vadd.f32 %v1198_v46, %v2243_v57  ;;  %vm1215_vm6 = vcmp.gt.f32.partialorder %v1211_v45, 20.0 }
 0x401   : > { %v1805_v49 = vpop.f32.mrf.mxu1 }
 0x402   : > { %v1225_v50 = vmul.f32 1.442695, %v1219_v47  ;;  %v1212_v51 = vadd.f32 %v1667_v31, %v1199_v48 }
 0x404   : > { %1894 = vpow2.f32 %v1225_v50  ;;  %v1220_v52 = vmin.f32 %v1212_v51, 20.0  ;;  %vm1216_vm8 = vcmp.gt.f32.partialorder %v1212_v51, 20.0 }
 0x406   : > { %v1227_v53 = vmul.f32 1.442695, %v1220_v52 }
 0x408   : > { %1896 = vpow2.f32 %v1227_v53 }
 0x409   : > { %v1891_v54 = vpop.eup %1890 }
 0x40a   : > { %v1229_v55 = vadd.f32 1.0, %v1891_v54  ;;  %v1232_v60 = vmul.f32 -0.5, %v1891_v54  ;;  %v1235_v4 = vand.u32 2147483647, %v1891_v54 }
 0x40c   : > { %1898 = vlog2.f32 %v1229_v55  ;;  %v1233_v63 = vadd.f32 1.0, %v1232_v60  ;;  %vm1236_vm15 = vcmp.lt.f32.partialorder %v1235_v4, 0.0004427343 }
 0x40d   : > { %v1893_v56 = vpop.eup %1892 }
 0x40e   : > { %v1238_v58 = vadd.f32 1.0, %v1893_v56  ;;  %v1241_v57 = vmul.f32 -0.5, %v1893_v56  ;;  %v1234_v13 = vmul.f32 %v1891_v54, %v1233_v63  ;;  %v1244_v7 = vand.u32 2147483647, %v1893_v56 }
 0x410   : > { %1900 = vlog2.f32 %v1238_v58  ;;  %v1242_v14 = vadd.f32 1.0, %v1241_v57  ;;  %vm1245_vm3 = vcmp.lt.f32.partialorder %v1244_v7, 0.0004427343 }
 0x411   : > { %v1895_v59 = vpop.eup %1894 }
 0x412   : > { %v1247_v61 = vadd.f32 1.0, %v1895_v59  ;;  %v1250_v9 = vmul.f32 -0.5, %v1895_v59  ;;  %v1243_v17 = vmul.f32 %v1893_v56, %v1242_v14  ;;  %v1253_v20 = vand.u32 2147483647, %v1895_v59 }
 0x414   : > { %1902 = vlog2.f32 %v1247_v61  ;;  %v1251_v2 = vadd.f32 1.0, %v1250_v9  ;;  %vm1254_vm5 = vcmp.lt.f32.partialorder %v1253_v20, 0.0004427343 }
 0x415   : > { %v1897_v62 = vpop.eup %1896 }
 0x416   : > { %v1256_v0 = vadd.f32 1.0, %v1897_v62  ;;  %v1259_v18 = vmul.f32 -0.5, %v1897_v62  ;;  %v1252_v24 = vmul.f32 %v1895_v59, %v1251_v2  ;;  %v1262_v1 = vand.u32 2147483647, %v1897_v62 }
 0x418   : > { %1904 = vlog2.f32 %v1256_v0  ;;  %v1260_v25 = vadd.f32 1.0, %v1259_v18  ;;  %vm1263_vm7 = vcmp.lt.f32.partialorder %v1262_v1, 0.0004427343 }
 0x419   : > { %v1899_v11 = vpop.eup %1898 }
 0x41a   : > { %v1231_v12 = vmul.f32 0.6931472, %v1899_v11  ;;  %v1261_v30 = vmul.f32 %v1897_v62, %v1260_v25 }
 0x41c   : > { %v1237_v6 = vsel %vm1236_vm15, %v1234_v13, %v1231_v12  ;;  %v1673_v13 = vld [vmem:[%s2378_s7] ss:$0 sm:$0xff] }
 0x41d   : > { %v1901_v5 = vpop.eup %1900  ;;  %v1265_v16 = vsel %vm1213_vm2, %v1209_v34, %v1237_v6  ;;  %vm1481_vm2 = vcmask 1041409  }
 0x41e   : > { %1822 = vmatprep.mubr.msk.f32.mxu0 %vm1284_vm0, %v1265_v16  ;;  %v1240_v3 = vmul.f32 0.6931472, %v1901_v5 }
 0x420   : > { %v1246_v15 = vsel %vm1245_vm3, %v1243_v17, %v1240_v3  ;;  %vm1483_vm3 = vcmask 1042434  }
 0x421   : > { %v1903_v21 = vpop.eup %1902  ;;  %v1266_v22 = vsel %vm1214_vm4, %v1210_v40, %v1246_v15  ;;  %vm1485_vm4 = vcmask 1043459  }
 0x422   : > { %1823 = vmatmul.mubr.msk.f32.vlgmr.msra.gmra.mxu0 %vm1284_vm0, %v1266_v22  ;;  %v1249_v23 = vmul.f32 0.6931472, %v1903_v21 }
 0x424   : > { %v1255_v26 = vsel %vm1254_vm5, %v1252_v24, %v1249_v23  ;;  %vm1488_vm5 = vcmask 60416  }
 0x425   : > { %v1905_v27 = vpop.eup %1904  ;;  %v1267_v28 = vsel %vm1215_vm6, %v1211_v45, %v1255_v26 }
 0x426   : > { %1825 = vmatprep.mubr.msk.f32.mxu0 %vm1284_vm0, %v1267_v28  ;;  %v1258_v29 = vmul.f32 0.6931472, %v1905_v27 }
 0x428   : > { %v1264_v31 = vsel %vm1263_vm7, %v1261_v30, %v1258_v29 }
 0x429   : > { %v1268_v32 = vsel %vm1216_vm8, %v1212_v51, %v1264_v31 }
 0x42a   : > { %1826 = vmatmul.mubr.msk.f32.gmra.mxu0 %vm1284_vm0, %v1268_v32 }
 0x4e2   : > { %v1824_v34 = vpop.f32.mrf.mxu0 }
 0x4e3   : > { %v1369_v35 = vadd.f32 %v1824_v34, %v1668_v33 }
 0x4e4   : > { %v1363_v36 = vpop.f32.mrf.mxu0 }
 0x4e5   : > { %v1387_v37 = vmin.f32 %v1369_v35, 20.0  ;;  %v1364_v38 = vadd.f32 %v1668_v33, %v1363_v36  ;;  %vm1383_vm9 = vcmp.gt.f32.partialorder %v1369_v35, 20.0 }
 0x4e7   : > { %v1392_v39 = vmul.f32 1.442695, %v1387_v37  ;;  %v1386_v40 = vmin.f32 %v1364_v38, 20.0  ;;  %vm1382_vm12 = vcmp.gt.f32.partialorder %v1364_v38, 20.0 }
 0x4e9   : > { %1906 = vpow2.f32 %v1392_v39  ;;  %v1390_v41 = vmul.f32 1.442695, %v1386_v40  ;;  %v1467_v39 = vsub.s32 %v2211_v8, %v2173_v19  ;;  %v1497_v8 = vsub.s32 0, %v2173_v19 }
 0x4ea   : > { %v1827_v42 = vpop.f32.mrf.mxu0 }
 0x4eb   : > { %1908 = vpow2.f32 %v1390_v41  ;;  %v2306_v43 = vadd.f32 %v1827_v42, %v1668_v33 }
 0x4ec   : > { %v1373_v44 = vpop.f32.mrf.mxu0 }
 0x4ed   : > { %v1389_v10 = vmin.f32 %v2306_v43, 20.0  ;;  %v2309_v45 = vadd.f32 %v1668_v33, %v1373_v44  ;;  %vm1385_vm14 = vcmp.gt.f32.partialorder %v2306_v43, 20.0 }
 0x4ef   : > { %v1396_v46 = vmul.f32 1.442695, %v1389_v10  ;;  %v1388_v47 = vmin.f32 %v2309_v45, 20.0  ;;  %vm1384_vm0 = vcmp.gt.f32.partialorder %v2309_v45, 20.0 }
 0x4f1   : > { %1910 = vpow2.f32 %v1396_v46  ;;  %v1394_v48 = vmul.f32 1.442695, %v1388_v47 }
 0x4f3   : > { %1912 = vpow2.f32 %v1394_v48 }
 0x4f6   : > { %v1907_v49 = vpop.eup %1906 }
 0x4f7   : > { %v1407_v50 = vadd.f32 1.0, %v1907_v49  ;;  %v1410_v54 = vmul.f32 -0.5, %v1907_v49  ;;  %v1413_v61 = vand.u32 2147483647, %v1907_v49 }
 0x4f8   : > { %v1909_v51 = vpop.eup %1908 }
 0x4f9   : > { %1914 = vlog2.f32 %v1407_v50  ;;  %v1398_v52 = vadd.f32 1.0, %v1909_v51  ;;  %v1401_v58 = vmul.f32 -0.5, %v1909_v51  ;;  %v1411_v60 = vadd.f32 1.0, %v1410_v54 }
 0x4fa   : > { %v1404_v57 = vand.u32 2147483647, %v1909_v51  ;;  %vm1414_vm10 = vcmp.lt.f32.partialorder %v1413_v61, 0.0004427343 }
 0x4fb   : > { %1916 = vlog2.f32 %v1398_v52  ;;  %v1402_v62 = vadd.f32 1.0, %v1401_v58  ;;  %v1412_v4 = vmul.f32 %v1907_v49, %v1411_v60  ;;  %v1492_v49 = vld [vmem:[#allocation2] sm:$0x1] }
 0x4fc   : > { %vm1405_vm11 = vcmp.lt.f32.partialorder %v1404_v57, 0.0004427343  ;;  %v1493_v50 = vmul.f32 8.0, %v1492_v49 }
 0x4fd   : > { %v1403_v7 = vmul.f32 %v1909_v51, %v1402_v62 }
 0x4fe   : > { %v1911_v53 = vpop.eup %1910  ;;  %v1498_v51 = vrot.slane %v1493_v50, %v1497_v8 }
 0x4ff   : > { %v1425_v55 = vadd.f32 1.0, %v1911_v53  ;;  %v1428_v11 = vmul.f32 -0.5, %v1911_v53  ;;  %v1431_v18 = vand.u32 2147483647, %v1911_v53 }
 0x500   : > { %v1913_v56 = vpop.eup %1912 }
 0x501   : > { %1918 = vlog2.f32 %v1425_v55  ;;  %v1416_v59 = vadd.f32 1.0, %v1913_v56  ;;  %v1419_v6 = vmul.f32 -0.5, %v1913_v56  ;;  %v1429_v17 = vadd.f32 1.0, %v1428_v11 }
 0x502   : > { %v1422_v23 = vand.u32 2147483647, %v1913_v56  ;;  %vm1432_vm13 = vcmp.lt.f32.partialorder %v1431_v18, 0.0004427343 }
 0x503   : > { %1920 = vlog2.f32 %v1416_v59  ;;  %v1420_v21 = vadd.f32 1.0, %v1419_v6  ;;  %v1430_v1 = vmul.f32 %v1911_v53, %v1429_v17 }
 0x504   : > { %vm1423_vm15 = vcmp.lt.f32.partialorder %v1422_v23, 0.0004427343 }
 0x505   : > { %v1421_v29 = vmul.f32 %v1913_v56, %v1420_v21 }
 0x506   : > { %v1915_v63 = vpop.eup %1914 }
 0x507   : > { %v1409_v0 = vmul.f32 0.6931472, %v1915_v63 }
 0x508   : > { %v1917_v12 = vpop.eup %1916 }
 0x509   : > { %v1415_v14 = vsel %vm1414_vm10, %v1412_v4, %v1409_v0  ;;  %v1400_v9 = vmul.f32 0.6931472, %v1917_v12 }
 0x50a   : > { %v1435_v5 = vsel %vm1383_vm9, %v1369_v35, %v1415_v14 }
 0x50b   : > { %v1446_v16 = vmul.f32 %v1673_v13, %v1435_v5  ;;  %v1406_v3 = vsel %vm1405_vm11, %v1403_v7, %v1400_v9 }
 0x50c   : > { %v1434_v2 = vsel %vm1382_vm12, %v1364_v38, %v1406_v3 }
 0x50d   : > { %v1452_v20 = vsel %vm388_vm1, %v1446_v16, 0.0  ;;  %v1445_v15 = vmul.f32 %v1673_v13, %v1434_v2 }
 0x50e   : > { %v1919_v22 = vpop.eup %1918  ;;  %1453 = vadd.xlane.f32.xlu1 %v1452_v20 }
 0x50f   : > { %v1449_v24 = vsel %vm388_vm1, %v1445_v15, 0.0  ;;  %v1427_v25 = vmul.f32 0.6931472, %v1919_v22 }
 0x510   : > { %v1921_v26 = vpop.eup %1920  ;;  %1450 = vadd.xlane.f32.xlu0 %v1449_v24 }
 0x511   : > { %v1433_v27 = vsel %vm1432_vm13, %v1430_v1, %v1427_v25  ;;  %v1418_v28 = vmul.f32 0.6931472, %v1921_v26 }
 0x512   : > { %v1437_v30 = vsel %vm1385_vm14, %v2306_v43, %v1433_v27 }
 0x513   : > { %v1448_v31 = vmul.f32 %v1673_v13, %v1437_v30  ;;  %v1424_v32 = vsel %vm1423_vm15, %v1421_v29, %v1418_v28 }
 0x514   : > { %v1436_v33 = vsel %vm1384_vm0, %v2309_v45, %v1424_v32 }
 0x515   : > { %v1458_v34 = vsel %vm388_vm1, %v1448_v31, 0.0  ;;  %v1447_v35 = vmul.f32 %v1673_v13, %v1436_v33 }
 0x516   : > { %1459 = vadd.xlane.f32.xlu1 %v1458_v34 }
 0x517   : > { %v1455_v36 = vsel %vm388_vm1, %v1447_v35, 0.0  ;;  %vm1533_vm1 = vcmask 24576  }
 0x518   : > { %1456 = vadd.xlane.f32.xlu0 %v1455_v36 }
 0x597   : > { %v1454_v37 = vpop.xlane.xlu1 %1453 }
 0x598   : > { %v1472_v42 = vrot.slane %v1454_v37, %v1467_v39 }
 0x599   : > { %v1451_v38 = vpop.xlane.xlu0 %1450 }
 0x59a   : > { %v1468_v40 = vrot.slane %v1451_v38, %v1467_v39 }
 0x59c   : > { %v1482_v10 = vsel %vm1481_vm2, %v1472_v42, %v1468_v40 }
 0x59f   : > { %v1460_v41 = vpop.xlane.xlu1 %1459 }
 0x5a0   : > { %v1480_v45 = vrot.slane %v1460_v41, %v1467_v39 }
 0x5a1   : > { %v1457_v43 = vpop.xlane.xlu0 %1456 }
 0x5a2   : > { %v1476_v44 = vrot.slane %v1457_v43, %v1467_v39 }
 0x5a4   : > { %v1484_v46 = vsel %vm1483_vm3, %v1476_v44, %v1482_v10 }
 0x5a5   : > { %v1486_v47 = vsel %vm1485_vm4, %v1480_v45, %v1484_v46 }
 0x5a6   : > { %v1489_v48 = vsel %vm1488_vm5, %v1486_v47, 0.0 }
 0x5a7   : > { %1490 = vadd.xlane.f32.xlu0 %v1489_v48 }
 0x630   : > { %v1491_v52 = vpop.xlane.xlu0 %1490 }
 0x631   : > { %v1500_v53 = vadd.f32 %v1498_v51, %v1491_v52 }
 0x633   : > { %1501 = vxpose.xlu1.b32.start.end [1/1] (short) (narrow) %v1500_v53, 8 }
 0x6af   : > { %v1517_v54 = vpop.trf.xlu1 }
 0x6b0   : > { %1534 = vst.msk [vmem:[%s364_s28] sm:$0x1] %vm1533_vm1, %v1517_v54 }
 0x6b1   : > { %1935 = shalt.err (!%p1932_p5)
}
 0x6b2   : > { %s1936_s25 = scalar_lea.hbm %s2331_s8, 16  ;;  %s1940_s28 = scalar_lea.hbm %s2380_s9, 32 }
 0x6b3   : > { %p1937_p6 = scmp.ne.s32.totalorder %s2331_s8, %s1936_s25  ;;  %p1941_p10 = scmp.lt.s32.totalorder %s2331_s8, %s2380_s9 }
 0x6b4   : > { %p1942_p11 = scmp.lt.s32.totalorder %s1940_s28, %s1936_s25 }
 0x6b5   : > { %p1938_p7 = pnand %p1937_p6, %p2101_p4 }
 0x6b6   : > { %p1943_p12 = por %p1942_p11, %p1941_p10 }
 0x6b7   : > { %p1939_p9 = pneg %p1938_p7 }
 0x6b9   : > { %p1944_p13 = pnand %p1943_p12, %p1939_p9 }
 0x6bb   : > { %1947 = shalt.err (!%p1944_p13)
}
 0x6bc   : > { %1828 = dma.vmem_to_hbm [thread:$0]  (%p2101_p4), %s1550_s29, 16, %s2331_s8, %s1536_s17  }
 0x6bd PF: > { %p1834_p0 = scmp.ge.s32.totalorder %s1998_s16, 2  ;;  %s1561_s19 = sand.u32 1, %s1978_s11  }
 0x6be   : > { %s1562_s21 = scalar_lea.sflag [#allocation4], %s1561_s19 }
 0x6bf   : > { %p1831_p1 = pnand %p1834_p0, %p2108_p8 }
 0x6c1   : > { %p1832_p2 = pneg %p1831_p1 }
 0x6c3   : > { %1973 = dma.done.wait (%p1832_p2), %s1562_s21, 16  }
 0x6c4   : > { %1975 = vsyncadd (%p1832_p2), %s1562_s21, 4294967280  ;;  %s24_s16 = sadd.s32 1, %s1998_s16   ;;  %s2383_s11 = smov %s1982_s12 }
 0x6c5   : > { %p21_p3 = scmp.ge.s32.totalorder %s24_s16, 4   ;;  %s2384_s12 = smov %s1986_s13 }
 0x6c6   : > { %s2385_s13 = smov %s2114_s23  ;;  %s2386_s14 = smov %s1994_s15 }
 0x6c7   : > { %s2387_s15 = smov %s2389_s18  ;;  %23 = sbr.rel (!%p21_p3) target bundleno = 7 (0x7), region = 94 }
 0x6cc   :  { %1566 = vsyncpa [#allocation4], 1 }
 0x6cd   :  { %1568 = vsyncpa [#allocation4 + $0x1], 1 }

</bundles_post_ra>
